<compile_context>
chip_gen: v7x
topology: tpu7x:2x2x1
jax: 0.10.0
libtpu: 0.0.40
codegen_flags: <defaults>
</compile_context>

<pallas_src>
import numpy as np
import jax
import jax.numpy as jnp
from jax import lax
from jax.experimental import pallas as pl
from jax.experimental.pallas import tpu as pltpu


def _displace_frac_kernel(ay_ref, axt_ref, x_ref, o_ref):
    # ay_ref:  (H, H) bilinear row operator for this channel
    # axt_ref: (W, W) bilinear column operator (already transposed) for this channel
    # x_ref / o_ref: (b_block, H, W) planes of this channel
    ay = ay_ref[...]
    axt = axt_ref[...]
    x = x_ref[...].astype(jnp.float32)
    bblk, H, W = x.shape

    # Stage 1: width mixing. Flatten (batch, row) so the MXU sees M = b_block*H.
    t = lax.dot_general(
        x.reshape(bblk * H, W), axt,
        dimension_numbers=(((1,), (0,)), ((), ())),
        preferred_element_type=jnp.float32,
        precision=lax.Precision.HIGHEST,
    ).reshape(bblk, H, W)

    # Stage 2: height mixing, batched over the b_block planes (no in-kernel transpose).
    ay_b = jnp.broadcast_to(ay[None], (bblk, H, H))
    out = lax.dot_general(
        ay_b, t,
        dimension_numbers=(((2,), (1,)), ((0,), (0,))),
        preferred_element_type=jnp.float32,
        precision=lax.Precision.HIGHEST,
    )
    o_ref[...] = out.astype(o_ref.dtype)


def _bilinear_operators(offsets, H, W):
    """Per-channel banded bilinear operators A_y (C,H,H) and A_x^T (C,W,W)."""
    offsets = offsets.astype(jnp.float32)          # keep f32 before rounding (torch parity)
    off_int = jnp.round(offsets)                   # round-half-to-even == torch.round
    off_x = offsets[:, 0]
    off_y = offsets[:, 1]
    oxi = off_int[:, 0].astype(jnp.int32)
    oyi = off_int[:, 1].astype(jnp.int32)

    rows = jnp.arange(H, dtype=jnp.int32)
    # A_y[c, i, u] = max(0, 1 - |u - i + off_y[c]|) * [0 <= u + round(off_y[c]) < H]
    diff_y = (rows[None, None, :] - rows[None, :, None]).astype(jnp.float32) + off_y[:, None, None]
    a_y = jnp.maximum(0.0, 1.0 - jnp.abs(diff_y))
    u_shift = rows[None, None, :] + oyi[:, None, None]
    a_y = jnp.where((u_shift >= 0) & (u_shift < H), a_y, 0.0)            # (C, H, H)

    cols = jnp.arange(W, dtype=jnp.int32)
    # A_x^T[c, v, j] = max(0, 1 - |v - j + off_x[c]|) * [0 <= v + round(off_x[c]) < W]
    diff_x = (cols[None, :, None] - cols[None, None, :]).astype(jnp.float32) + off_x[:, None, None]
    a_xt = jnp.maximum(0.0, 1.0 - jnp.abs(diff_x))
    v_shift = cols[None, :, None] + oxi[:, None, None]
    a_xt = jnp.where((v_shift >= 0) & (v_shift < W), a_xt, 0.0)          # (C, W, W)
    return a_y, a_xt


def displace_frac_pallas(x, offsets, *, b_block=None):
    B, C, H, W = x.shape
    a_y, a_xt = _bilinear_operators(offsets, H, W)

    if b_block is None:
        # Keep double-buffered (in + out) blocks ~<=16 MiB so the same block size
        # is safe on v7x (64 MiB physical / 32 MiB scoped VMEM), while using the
        # largest batch tile that fits on v5e/v6e.
        b_block = max(1, min(B, (1 << 20) // max(H * W, 1)))
    nb = pl.cdiv(B, b_block)

    return pl.pallas_call(
        _displace_frac_kernel,
        out_shape=jax.ShapeDtypeStruct((B, C, H, W), x.dtype),
        grid_spec=pl.GridSpec(
            grid=(C, nb),
            in_specs=[
                pl.BlockSpec((None, H, H), lambda c, b: (c, 0, 0)),   # A_y[c], resident across b
                pl.BlockSpec((None, W, W), lambda c, b: (c, 0, 0)),   # A_x^T[c], resident across b
                pl.BlockSpec((b_block, None, H, W), lambda c, b: (b, c, 0, 0)),
            ],
            out_specs=pl.BlockSpec((b_block, None, H, W), lambda c, b: (b, c, 0, 0)),
        ),
        compiler_params=pltpu.CompilerParams(
            dimension_semantics=("parallel", "parallel")),
    )(a_y, a_xt, x)


class DisplaceFrac:
    """JAX/Pallas port of the PyTorch DisplaceFrac module (chan_per_pos == 1)."""

    def __init__(self, num_offsets):
        # field[o, ky, kx] = (kx - 1, ky - 1), shape (num_offsets, 3, 3, 2); deterministic buffer.
        xs = jnp.broadcast_to(jnp.arange(3, dtype=jnp.float32).reshape(1, 3, 1), (3, 3, 1)) - 1.0
        ys = jnp.broadcast_to(jnp.arange(3, dtype=jnp.float32).reshape(3, 1, 1), (3, 3, 1)) - 1.0
        field = jnp.concatenate([xs, ys], axis=2)                     # (3, 3, 2)
        self.field = jnp.tile(field[None], (num_offsets, 1, 1, 1))    # (num_offsets, 3, 3, 2)

    def __call__(self, x, offsets, chan_per_pos):
        assert chan_per_pos == 1
        assert x.shape[1] == offsets.shape[0]
        return displace_frac_pallas(x, offsets)


def _reference(x, offsets, field):
    """NumPy re-implementation mirroring the PyTorch forward, for verification."""
    x = np.asarray(x, dtype=np.float32)
    offsets = np.asarray(offsets, dtype=np.float32)
    field = np.asarray(field, dtype=np.float32)
    B, C, H, W = x.shape
    off_int_f = np.round(offsets)
    frac = offsets - off_int_f
    off_int = off_int_f.astype(np.int64)

    # Integer displacement (DisplaceCUDA): x1[:, c, y, x] = x[:, c, y-oy, x-ox], zero fill.
    x1 = np.zeros_like(x)
    for c in range(C):
        ox, oy = int(off_int[c, 0]), int(off_int[c, 1])
        for yy in range(H):
            ys = yy - oy
            if not (0 <= ys < H):
                continue
            for xx in range(W):
                xs = xx - ox
                if 0 <= xs < W:
                    x1[:, c, yy, xx] = x[:, c, ys, xs]

    # kernel = (1 - |field + frac|).clamp(min=0).prod(-1)  -> (C, 3, 3)
    k = np.clip(1.0 - np.abs(field + frac[:, None, None, :]), 0.0, None).prod(-1)

    # Depthwise 3x3 conv, stride 1, padding 1, groups=C.
    xp = np.pad(x1, ((0, 0), (0, 0), (1, 1), (1, 1)))
    out = np.zeros_like(x)
    for ky in range(3):
        for kx in range(3):
            out += xp[:, :, ky:ky + H, kx:kx + W] * k[None, :, ky, kx, None, None]
    return out


if __name__ == "__main__":
    B, C, H, W = 2, 4, 16, 16   # C == num_offsets (chan_per_pos == 1)
    key = jax.random.PRNGKey(0)
    kx, ko = jax.random.split(key)
    x = jax.random.normal(kx, (B, C, H, W), dtype=jnp.float32)
    offsets = jax.random.uniform(ko, (C, 2), dtype=jnp.float32, minval=-2.5, maxval=2.5)

    module = DisplaceFrac(num_offsets=C)
    out = module(x, offsets, chan_per_pos=1)
    out = jax.block_until_ready(out)

    ref = _reference(x, offsets, module.field)
    np.testing.assert_allclose(np.asarray(out), ref, rtol=1e-4, atol=1e-4)
    print("KERNEL_OK")
</pallas_src>

<mosaic_0001>
module attributes {stable_mosaic.version = 11 : i64} {
  func.func @_displace_frac_kernel(%arg0: i32, %arg1: i32, %arg2: memref<1x16x16xf32, #tpu.memory_space<vmem>>, %arg3: memref<1x16x16xf32, #tpu.memory_space<vmem>>, %arg4: memref<2x1x16x16xf32, #tpu.memory_space<vmem>>, %arg5: memref<2x1x16x16xf32, #tpu.memory_space<vmem>>) attributes {dimension_semantics = [#tpu.dimension_semantics<parallel>, #tpu.dimension_semantics<parallel>], iteration_bounds = array<i64: 4, 1>, scalar_prefetch = 0 : i64, scratch_operands = 0 : i64, tpu.core_type = #tpu.core_type<tc>, window_params = [{transform_indices = @transform_0, window_bounds = array<i64: 1, 16, 16>}, {transform_indices = @transform_1, window_bounds = array<i64: 1, 16, 16>}, {transform_indices = @transform_2, window_bounds = array<i64: 2, 1, 16, 16>}, {transform_indices = @transform_3, window_bounds = array<i64: 2, 1, 16, 16>}]} {
    %c0 = arith.constant 0 : index
    %c0_0 = arith.constant 0 : index
    %c0_1 = arith.constant 0 : index
    %0 = vector.load %arg2[%c0, %c0_0, %c0_1] : memref<1x16x16xf32, #tpu.memory_space<vmem>>, vector<1x16x16xf32>
    %1 = vector.shape_cast %0 : vector<1x16x16xf32> to vector<16x16xf32>
    %c0_2 = arith.constant 0 : index
    %c0_3 = arith.constant 0 : index
    %c0_4 = arith.constant 0 : index
    %2 = vector.load %arg3[%c0_2, %c0_3, %c0_4] : memref<1x16x16xf32, #tpu.memory_space<vmem>>, vector<1x16x16xf32>
    %3 = vector.shape_cast %2 : vector<1x16x16xf32> to vector<16x16xf32>
    %c0_5 = arith.constant 0 : index
    %c0_6 = arith.constant 0 : index
    %c0_7 = arith.constant 0 : index
    %c0_8 = arith.constant 0 : index
    %4 = vector.load %arg4[%c0_5, %c0_6, %c0_7, %c0_8] : memref<2x1x16x16xf32, #tpu.memory_space<vmem>>, vector<2x1x16x16xf32>
    %5 = vector.shape_cast %4 : vector<2x1x16x16xf32> to vector<2x16x16xf32>
    %6 = vector.shape_cast %5 : vector<2x16x16xf32> to vector<32x16xf32>
    %cst = arith.constant dense<0.000000e+00> : vector<32x16xf32>
    %7 = tpu.matmul %6, %3, %cst {dimension_numbers = #tpu.dot_dimension_numbers<[1], [0], [0], [1], [0, 0, 1, 1], [], []>, precision = #tpu.contract_precision<fp32>} : vector<32x16xf32>, vector<16x16xf32>, vector<32x16xf32> -> vector<32x16xf32>
    %8 = vector.shape_cast %7 : vector<32x16xf32> to vector<2x16x16xf32>
    %9 = vector.shape_cast %1 : vector<16x16xf32> to vector<1x16x16xf32>
    %10 = vector.shape_cast %9 : vector<1x16x16xf32> to vector<1x16x16xf32>
    %11 = vector.broadcast %10 : vector<1x16x16xf32> to vector<2x16x16xf32>
    %cst_9 = arith.constant dense<0.000000e+00> : vector<2x16x16xf32>
    %12 = tpu.matmul %11, %8, %cst_9 {dimension_numbers = #tpu.dot_dimension_numbers<[2], [1], [1], [2], [0, 0, 0, 1, 1, 2], [0], [0]>, precision = #tpu.contract_precision<fp32>} : vector<2x16x16xf32>, vector<2x16x16xf32>, vector<2x16x16xf32> -> vector<2x16x16xf32>
    %c0_10 = arith.constant 0 : index
    %c0_11 = arith.constant 0 : index
    %c0_12 = arith.constant 0 : index
    %c0_13 = arith.constant 0 : index
    %13 = vector.load %arg5[%c0_10, %c0_11, %c0_12, %c0_13] : memref<2x1x16x16xf32, #tpu.memory_space<vmem>>, vector<2x1x16x16xf32>
    %14 = vector.shape_cast %13 : vector<2x1x16x16xf32> to vector<2x16x16xf32>
    %15 = vector.shape_cast %12 : vector<2x16x16xf32> to vector<2x1x16x16xf32>
    tpu.vector_store %arg5[%c0_10, %c0_11, %c0_12, %c0_13], %15 {strides = array<i32>} : memref<2x1x16x16xf32, #tpu.memory_space<vmem>>, vector<2x1x16x16xf32>,
    return
  }
  func.func @transform_0(%arg0: i32, %arg1: i32) -> (i32, i32, i32) {
    %c0_i32 = arith.constant 0 : i32
    %c0_i32_0 = arith.constant 0 : i32
    %c0_i32_1 = arith.constant 0 : i32
    return %arg0, %c0_i32, %c0_i32_0 : i32, i32, i32
  }
  func.func @transform_1(%arg0: i32, %arg1: i32) -> (i32, i32, i32) {
    %c0_i32 = arith.constant 0 : i32
    %c0_i32_0 = arith.constant 0 : i32
    %c0_i32_1 = arith.constant 0 : i32
    return %arg0, %c0_i32, %c0_i32_0 : i32, i32, i32
  }
  func.func @transform_2(%arg0: i32, %arg1: i32) -> (i32, i32, i32, i32) {
    %c0_i32 = arith.constant 0 : i32
    %c0_i32_0 = arith.constant 0 : i32
    %c0_i32_1 = arith.constant 0 : i32
    return %arg1, %arg0, %c0_i32, %c0_i32_0 : i32, i32, i32, i32
  }
  func.func @transform_3(%arg0: i32, %arg1: i32) -> (i32, i32, i32, i32) {
    %c0_i32 = arith.constant 0 : i32
    %c0_i32_0 = arith.constant 0 : i32
    %c0_i32_1 = arith.constant 0 : i32
    return %arg1, %arg0, %c0_i32, %c0_i32_0 : i32, i32, i32, i32
  }
}

</mosaic_0001>

<bundles_post_ra>
// kernel: tpu_custom_call.1
= control target key start
LH: loop header
LB: loop body
LE: loop exit
PB: predicated region body
PF: predicated region fallthrough
CT: control target
= control target key end

     0   :  { %s3019_s0 = inlined_call_operand.hbm [shape: f32[4,16,16], index: 0, kind: input, shape index: {}]   ;;  %s3020_s1 = inlined_call_operand.hbm [shape: f32[4,16,16], index: 1, kind: input, shape index: {}]   ;;  %s3021_s2 = inlined_call_operand.hbm [shape: f32[2,4,16,16], index: 2, kind: input, shape index: {}]   ;;  %s3022_s3 = inlined_call_operand.hbm [shape: f32[2,4,16,16], index: 3, kind: output, shape index: {}]  }
   0x1   :  { %3025 = sst [smem:[#allocation18_spill]] %s3019_s0 }
   0x2   :  { %8 = vsyncpa [#allocation3], 0 }
   0x3   :  { %10 = vsyncpa [#allocation3 + $0x1], 0 }
   0x4   :  { %11 = vsyncpa [#allocation6], 0 }
   0x5   :  { %13 = vsyncpa [#allocation6 + $0x1], 0 }
   0x6   :  { %14 = vsyncpa [#allocation4], 0 }
   0x7   :  { %16 = vsyncpa [#allocation4 + $0x1], 0  ;;  %s2722_s12 = smov 0   ;;  %s2724_s13 = smov 0  }
   0x8   :  { %s2726_s14 = smov 0   ;;  %s2728_s15 = smov 0  }
   0x9   :  { %s2730_s16 = smov 0   ;;  %s2732_s17 = smov 0  }
   0xa LB: > { %s2753_s18 = sadd.s32 4294967295, %s2683_s17   ;;  %s2112_s19 = sadd.s32 4294967294, %s2683_s17   ;;  %s2683_s17 = sphi %s2732_s17, %s22_s17   ;;  %s2679_s16 = sphi %s2730_s16, %s3039_s16   ;;  %s2675_s15 = sphi %s2728_s15, %s3038_s15   ;;  %s2671_s14 = sphi %s2726_s14, %s3037_s14   ;;  %s2667_s13 = sphi %s2724_s13, %s3036_s13   ;;  %s2663_s12 = sphi %s2722_s12, %s3035_s12  }
   0xb   : > { %s34_s20 = sadd.s32 1, %s2679_s16  ;;  %s41_s21 = sadd.s32 1, %s2671_s14 }
   0xc   : > { %p36_p0 = scmp.ge.s32.totalorder %s34_s20, 4  ;;  %p48_p1 = scmp.ne.s32.totalorder %s2671_s14, %s2667_s13 }
   0xd   : > { %p49_p2 = scmp.eq.s32.totalorder %s2683_s17, 0  ;;  %p54_p3 = scmp.ne.s32.totalorder %s2667_s13, %s2663_s12 }
   0xe   : > { %s3041_s20 = smov (%p36_p0, %s34_s20), 0  ;;  %p55_p5 = scmp.eq.s32.totalorder %s2753_s18, 0 }
   0xf   : > { %3026 = sst [smem:[#allocation17_spill]] %s3041_s20  ;;  %p2765_p4 = por %p49_p2, %p48_p1 }
  0x10   : > { %s38_s23 = ssub.s32 %s2679_s16, %s3041_s20  ;;  %p134_p6 = scmp.eq.s32.totalorder %s2753_s18, 3 }
  0x11   : > { %p39_p7 = scmp.eq.s32.totalorder %s38_s23, 0  ;;  %p2773_p8 = por %p55_p5, %p54_p3 }
  0x12   : > { %p2777_p9 = por %p134_p6, %p48_p1  ;;  %p140_p10 = scmp.eq.s32.totalorder %s2112_s19, 3 }
  0x13   : > { %s2782_s26 = scalar_select %p39_p7, %s2671_s14, %s41_s21  }
  0x14   : > { %s3029_s25 = scalar_select %p2777_p9, 1, 0 }
  0x15   : > { %p2784_p11 = por %p140_p10, %p54_p3  ;;  %p2114_p12 = scmp.ge.s32.totalorder %s2683_s17, 4 }
  0x16   : > { %s2790_s28 = sand.u32 (!%p2114_p12), 1, %s2671_s14   ;;  %s2793_s29 = sshll.u32 (!%p2114_p12), %s2679_s16, 8 }
  0x17   : > { %s3030_s27 = scalar_select %p2784_p11, 1, 0 }
  0x18   : > { %156 = sbr.rel (%p2114_p12) target bundleno = 91 (0x5b), region = 16  ;;  %s2115_s30 = sshll.u32 (!%p2114_p12), %s2790_s28, 4 }
  0x19   : > { %s3031_s0 = sld [smem:[#allocation18_spill]] (!%p2114_p12)  ;;  %s164_s7 = scalar_lea.vmem (!%p2114_p12), [#allocation2], %s2115_s30 }
  0x1a   : > { %s171_s8 = sshll.u32 (!%p2114_p12), %s164_s7, 4  ;;  %s161_s9 = scalar_lea.sflag (!%p2114_p12), [#allocation3], %s2790_s28  ;;  %s2804_s8 = int_to_ptr.vmem [resolvable:$true] %s171_s8 }
  0x1f   : > { %s2800_s6 = scalar_lea.hbm %s3031_s0, %s2793_s29  ;;  %s2573_s21 = scalar_lea.hbm %s3031_s0, 1024 }
  0x20   : > { %s2569_s10 = scalar_lea.hbm %s2800_s6, 256  ;;  %p2574_p2 = scmp.lt.u32.totalorder %s2800_s6, %s3031_s0 }
  0x21   : > { %p2570_p13 = scmp.ne.s32.totalorder %s2800_s6, %s2569_s10  ;;  %p2575_p3 = scmp.lt.u32.totalorder %s2573_s21, %s2569_s10 }
  0x22   : > { %p2577_p6 = scmp.lt.u32.totalorder %s2569_s10, %s2800_s6 }
  0x23   : > { %p2571_p0 = pnand %p2570_p13, %p2765_p4  ;;  %p2576_p5 = por %p2575_p3, %p2574_p2 }
  0x25   : > { %p2572_p1 = pneg %p2571_p0  ;;  %p2578_p7 = por %p2577_p6, %p2576_p5 }
  0x27   : > { %p2579_p10 = pnand %p2578_p7, %p2572_p1 }
  0x29   : > { %2582 = shalt.err (!%p2579_p10)
}
  0x2a   : > { %s2583_s5 = scalar_lea.vmem %s2804_s8, 256  ;;  %s2685_s7 = smov [#allocation2]  }
  0x2b   : > { %p2584_p12 = scmp.ne.s32.totalorder %s2804_s8, %s2583_s5  ;;  %s2587_s11 = sshll.u32 %s2685_s7, 4  ;;  %s2588_s11 = int_to_ptr.vmem [resolvable:$false] %s2587_s11 }
  0x2c   : > { %s2589_s19 = scalar_lea.vmem %s2588_s11, 512  ;;  %p2590_p11 = scmp.lt.s32.totalorder %s2804_s8, %s2588_s11 }
  0x2d   : > { %p2585_p13 = pnand %p2584_p12, %p2765_p4  ;;  %p2591_p9 = scmp.lt.s32.totalorder %s2589_s19, %s2583_s5 }
  0x2f   : > { %p2586_p0 = pneg %p2585_p13  ;;  %p2592_p2 = por %p2591_p9, %p2590_p11 }
  0x31   : > { %p2593_p3 = pnand %p2592_p2, %p2586_p0 }
  0x33   : > { %2596 = shalt.err (!%p2593_p3)
}
  0x34   : > { %s2686_s10 = smov 128   ;;  %s2687_s21 = smov 8  }
  0x35   : > { %2480 = dma.hbm_to_vmem [thread:$0]  (%p2765_p4), %s2800_s6, 256, %s2804_s8, %s161_s9, %s2686_s10, %s2686_s10, %s2687_s21  }
  0x36   : > { %s181_s23 = sand.u32 1, %s2683_s17   ;;  %s2838_s7 = scalar_lea.hbm %s3020_s1, %s2793_s29 }
  0x37   : > { %s185_s11 = scalar_lea.vmem [#allocation5], %s2115_s30  ;;  %s2844_s0 = scalar_lea.sflag [#allocation6], %s181_s23 }
  0x38   : > { %s192_s19 = sshll.u32 %s185_s11, 4  ;;  %s2597_s20 = scalar_lea.hbm %s2838_s7, 256  ;;  %s2842_s19 = int_to_ptr.vmem [resolvable:$true] %s192_s19 }
  0x39   : > { %p2598_p9 = scmp.ne.s32.totalorder %s2838_s7, %s2597_s20  ;;  %s2601_s9 = scalar_lea.hbm %s3020_s1, 1024 }
  0x3a   : > { %p2602_p5 = scmp.lt.u32.totalorder %s2838_s7, %s3020_s1  ;;  %p2603_p6 = scmp.lt.u32.totalorder %s2601_s9, %s2597_s20 }
  0x3b   : > { %p2599_p11 = pnand %p2598_p9, %p2765_p4  ;;  %p2605_p10 = scmp.lt.u32.totalorder %s2597_s20, %s2838_s7 }
  0x3c   : > { %p2604_p7 = por %p2603_p6, %p2602_p5 }
  0x3d   : > { %p2600_p1 = pneg %p2599_p11 }
  0x3e   : > { %p2606_p12 = por %p2605_p10, %p2604_p7 }
  0x40   : > { %p2607_p13 = pnand %p2606_p12, %p2600_p1 }
  0x42   : > { %2610 = shalt.err (!%p2607_p13)
}
  0x43   : > { %s2611_s30 = scalar_lea.vmem %s2842_s19, 256  ;;  %s2688_s23 = smov [#allocation5]  }
  0x44   : > { %p2612_p0 = scmp.ne.s32.totalorder %s2842_s19, %s2611_s30  ;;  %s2615_s11 = sshll.u32 %s2688_s23, 4  ;;  %s2616_s11 = int_to_ptr.vmem [resolvable:$false] %s2615_s11 }
  0x45   : > { %s2617_s6 = scalar_lea.vmem %s2616_s11, 512  ;;  %p2618_p9 = scmp.lt.s32.totalorder %s2842_s19, %s2616_s11 }
  0x46   : > { %p2613_p2 = pnand %p2612_p0, %p2765_p4  ;;  %p2619_p11 = scmp.lt.s32.totalorder %s2617_s6, %s2611_s30 }
  0x48   : > { %p2614_p3 = pneg %p2613_p2  ;;  %p2620_p5 = por %p2619_p11, %p2618_p9 }
  0x4a   : > { %p2621_p6 = pnand %p2620_p5, %p2614_p3 }
  0x4c   : > { %2624 = shalt.err (!%p2621_p6)
}
  0x4d   : > { %2481 = dma.hbm_to_vmem [thread:$0]  (%p2765_p4), %s2838_s7, 256, %s2842_s19, %s2844_s0, %s2686_s10, %s2686_s10, %s2687_s21  }
  0x4e   : > { %s2121_s20 = sshll.u32 %s2790_s28, 5  ;;  %s215_s5 = scalar_lea.hbm %s3021_s2, %s2793_s29 }
  0x4f   : > { %s2482_s8 = scalar_select %p2765_p4, [#allocation0], [#allocation13] }
  0x50   : > { %s2689_s30 = smov 1024   ;;  %s206_s21 = scalar_lea.vmem [#allocation7], %s2121_s20 }
  0x51   : > { %2483 = sst [smem:[#allocation10]] (%p2765_p4), %s2689_s30  ;;  %s228_s7 = sshll.u32 %s206_s21, 4  ;;  %s229_s7 = int_to_ptr.vmem [resolvable:$true] %s228_s7 }
  0x52   : > { %s220_s10 = sld [smem:[%s2482_s8]]   ;;  %s2690_s19 = smov 256  }
  0x53   : > { %2484 = sst [smem:[#allocation10 + $0x1]] (%p2765_p4), %s2690_s19  ;;  %s2691_s23 = smov 2  }
  0x54   : > { %2485 = sst [smem:[#allocation10 + $0x2]] (%p2765_p4), %s2691_s23  ;;  %s2692_s28 = smov 128  }
  0x55   : > { %2486 = sst [smem:[#allocation10 + $0x3]] (%p2765_p4), %s2692_s28  ;;  %s2693_s11 = smov 8  }
  0x56   : > { %2487 = sst [smem:[#allocation10 + $0x4]] (%p2765_p4), %s2692_s28  ;;  %s2694_s8 = smov [#allocation9]  }
  0x57   : > { %2488 = sst [smem:[#allocation10 + $0x5]] (%p2765_p4), %s2693_s11 }
  0x58   : > { %s2124_s29 = sshll.u32 %s220_s10, 26 }
  0x59   : > { %s2125_s6 = sadd.s32 134217728, %s2124_s29 }
  0x5a   : > { %2489 = dma.general (%p2765_p4), %s215_s5, 512, %s229_s7, %s2844_s0, %s2694_s8, [#allocation10], %s2125_s6, 0  }
  0x5b PF: > { %p2126_p1 = scmp.ge.s32.totalorder %s2683_s17, 1  ;;  %p249_p7 = scmp.lt.s32.totalorder %s2683_s17, 5 }
  0x5d   : > { %p250_p10 = pnand %p2126_p1, %p249_p7 }
  0x5e   : > { %s2896_s20 = sand.u32 (!%p250_p10), 1, %s2667_s13  }
  0x5f   : > { %253 = sbr.rel (%p250_p10) target bundleno = 691 (0x2b3), region = 32  ;;  %s2127_s9 = sshll.u32 (!%p250_p10), %s2896_s20, 4 }
  0x60   : > { %s256_s4 = scalar_lea.sflag (!%p250_p10), [#allocation3], %s2896_s20  ;;  %s2900_s30 = scalar_lea.vmem (!%p250_p10), [#allocation2], %s2127_s9 }
  0x66   : > { %2650 = dma.done.wait (%p2773_p8), %s256_s4, 256  }
  0x67   : > { %2652 = vsyncadd (%p2773_p8), %s256_s4, 4294967040  ;;  %s264_s0 = sand.u32 1, %s2753_s18   ;;  %s268_s5 = scalar_lea.vmem [#allocation5], %s2127_s9 }
  0x68   : > { %s265_s22 = scalar_lea.sflag [#allocation6], %s264_s0 }
  0x69   : > { %2654 = dma.done.wait (%p2773_p8), %s265_s22, 768  }
  0x6a   : > { %2656 = vsyncadd (%p2773_p8), %s265_s22, 4294966528  ;;  %s2129_s10 = sshll.u32 %s2896_s20, 5  ;;  %vm320_vm0 = vcmask 130048   ;;  %v314_v0 = vld [vmem:[%s268_s5] sm:$0xff]  ;;  %v315_v1 = vld [vmem:[%s268_s5 + $0x8] sm:$0xff]  ;;  %s1936_s24 = scalar_lea.sflag [#allocation4], %s2896_s20 }
  0x6b   : > { %s277_s21 = scalar_lea.vmem [#allocation7], %s2129_s10  ;;  %v334_v3 = vand.u32 4294901760, %v314_v0  ;;  %v337_v4 = vand.u32 4294901760, %v315_v1  ;;  %v312_v44 = vld [vmem:[%s2900_s30] sm:$0xff]  ;;  %v313_v51 = vld [vmem:[%s2900_s30 + $0x8] sm:$0xff]  ;;  %s309_s18 = scalar_lea.vmem [#allocation8], %s2129_s10 }
  0x6c   : > { %v316_v2 = vld [vmem:[%s277_s21] sm:$0xff]  ;;  %v317_v6 = vld [vmem:[%s277_s21 + $0x8] sm:$0xff]  ;;  %v318_v7 = vld [vmem:[%s277_s21 + $0x10] sm:$0xff]  ;;  %v922_v45 = vsel %vm320_vm0, %v312_v44, 0  ;;  %v925_v52 = vsel %vm320_vm0, %v313_v51, 0 }
  0x6d   : > { %v322_v5 = vsel %vm320_vm0, %v316_v2, 0  ;;  %v319_v8 = vld [vmem:[%s277_s21 + $0x18] sm:$0xff]  ;;  %v325_v10 = vsel %vm320_vm0, %v317_v6, 0  ;;  %v328_v11 = vsel %vm320_vm0, %v318_v7, 0  ;;  %v2368_v13 = vpack.c.bf16 %v337_v4, %v334_v3 }
  0x6e   : > { %v2915_v9 = vand.u32 4294901760, %v322_v5  ;;  %v331_v12 = vsel %vm320_vm0, %v319_v8, 0  ;;  %v410_v14 = vand.u32 4294901760, %v325_v10  ;;  %v420_v15 = vand.u32 4294901760, %v328_v11 }
  0x6f   : > { %v430_v16 = vand.u32 4294901760, %v331_v12  ;;  %v442_v18 = vsub.f32 %v314_v0, %v334_v3  ;;  %v449_v19 = vsub.f32 %v315_v1, %v337_v4  ;;  %2369 = vmatprep.subr.bf16.mxu0 %v2368_v13  ;;  %v2926_v46 = vand.u32 4294901760, %v922_v45 }
  0x70   : > { %v401_v17 = vsub.f32 %v322_v5, %v2915_v9  ;;  %v411_v20 = vsub.f32 %v325_v10, %v410_v14  ;;  %v421_v21 = vsub.f32 %v328_v11, %v420_v15  ;;  %2371 = vmatpush3.bf16.msra.mxu0 %v2368_v13  ;;  %v2941_v53 = vand.u32 4294901760, %v925_v52 }
  0x71   : > { %v431_v22 = vsub.f32 %v331_v12, %v430_v16  ;;  %v443_v24 = vand.u32 4294901760, %v442_v18  ;;  %v450_v25 = vand.u32 4294901760, %v449_v19  ;;  %v2376_v41 = vpack.c.bf16 %v449_v19, %v442_v18 }
  0x72   : > { %v402_v23 = vand.u32 4294901760, %v401_v17  ;;  %v412_v26 = vand.u32 4294901760, %v411_v20  ;;  %v422_v27 = vand.u32 4294901760, %v421_v21  ;;  %v2929_v47 = vsub.f32 %v922_v45, %v2926_v46 }
  0x73   : > { %v432_v28 = vand.u32 4294901760, %v431_v22  ;;  %v444_v30 = vsub.f32 %v442_v18, %v443_v24  ;;  %v451_v31 = vsub.f32 %v449_v19, %v450_v25  ;;  %v2384_v43 = vpack.c.bf16 %v450_v25, %v443_v24 }
  0x74   : > { %v403_v29 = vsub.f32 %v401_v17, %v402_v23  ;;  %v413_v32 = vsub.f32 %v411_v20, %v412_v26  ;;  %v423_v33 = vsub.f32 %v421_v21, %v422_v27  ;;  %v2932_v48 = vand.u32 4294901760, %v2929_v47 }
  0x75   : > { %v433_v34 = vsub.f32 %v431_v22, %v432_v28  ;;  %v445_v36 = vand.u32 4294901760, %v444_v30  ;;  %v452_v37 = vand.u32 4294901760, %v451_v31  ;;  %v2944_v54 = vsub.f32 %v925_v52, %v2941_v53 }
  0x76   : > { %v404_v35 = vand.u32 4294901760, %v403_v29  ;;  %v414_v38 = vand.u32 4294901760, %v413_v32  ;;  %v424_v39 = vand.u32 4294901760, %v423_v33  ;;  %v997_v49 = vsub.f32 %v2929_v47, %v2932_v48 }
  0x77   : > { %v2372_v40 = vpack.c.bf16 %v452_v37, %v445_v36  ;;  %v434_v42 = vand.u32 4294901760, %v433_v34  ;;  %v2947_v55 = vand.u32 4294901760, %v2944_v54 }
  0x78   : > { %2228 = vmatprep.mubr.f32.mxu0 %v404_v35  ;;  %v2936_v50 = vand.u32 4294901760, %v997_v49 }
  0x79   : > { %2229 = vmatmul.mubr.f32.vlgmr.msra.gmra.mrb[0].mxu0 %v414_v38  ;;  %2373 = vmatprep.subr.bf16.mxu0 %v2372_v40  ;;  %v1007_v60 = vsub.f32 %v2944_v54, %v2947_v55 }
  0x7a   : > { %2231 = vmatprep.mubr.f32.mxu0 %v424_v39  ;;  %2375 = vmatpush3.bf16.msra.mxu0 %v2372_v40 }
  0x7b   : > { %2377 = vmatprep.subr.bf16.mxu0 %v2376_v41  ;;  %2288 = vmatprep.mubr.f32.mxu1 %v2936_v50  ;;  %v1008_v6 = vand.u32 4294901760, %v1007_v60 }
  0x7d   : > { %2232 = vmatmul.mubr.f32.gmra.mrb[2].mxu0 %v434_v42 }
  0x7e   : > { %2238 = vmatprep.mubr.f32.mxu0 %v2915_v9 }
  0x81   : > { %2239 = vmatmul.mubr.f32.vlgmr.msra.gmra.mrb[0].mxu0 %v410_v14 }
  0x82   : > { %2241 = vmatprep.mubr.f32.mxu0 %v420_v15  ;;  %2379 = vmatpush3.bf16.msra.mxu0 %v2376_v41 }
  0x83   : > { %2381 = vmatprep.subr.bf16.mxu0 %v2368_v13 }
  0x85   : > { %2242 = vmatmul.mubr.f32.gmra.mrb[2].mxu0 %v430_v16 }
  0x86   : > { %2248 = vmatprep.mubr.f32.mxu0 %v401_v17 }
  0x89   : > { %2249 = vmatmul.mubr.f32.vlgmr.msra.gmra.mrb[0].mxu0 %v411_v20 }
  0x8a   : > { %2251 = vmatprep.mubr.f32.mxu0 %v421_v21  ;;  %2383 = vmatpush3.bf16.msra.mxu0 %v2368_v13 }
  0x8b   : > { %2385 = vmatprep.subr.bf16.mxu0 %v2384_v43 }
  0x8d   : > { %2252 = vmatmul.mubr.f32.gmra.mrb[2].mxu0 %v431_v22 }
  0x8e   : > { %2258 = vmatprep.mubr.f32.mxu0 %v402_v23 }
  0x91   : > { %2259 = vmatmul.mubr.f32.vlgmr.msra.gmra.mrb[0].mxu0 %v412_v26 }
  0x92   : > { %2261 = vmatprep.mubr.f32.mxu0 %v422_v27  ;;  %2387 = vmatpush3.bf16.msra.mxu0 %v2384_v43 }
  0x93   : > { %2389 = vmatprep.subr.bf16.mxu0 %v2368_v13 }
  0x95   : > { %2262 = vmatmul.mubr.f32.gmra.mrb[2].mxu0 %v432_v28 }
  0x96   : > { %2268 = vmatprep.mubr.f32.mxu0 %v2915_v9 }
  0x99   : > { %2269 = vmatmul.mubr.f32.vlgmr.msra.gmra.mrb[0].mxu0 %v410_v14 }
  0x9a   : > { %2271 = vmatprep.mubr.f32.mxu0 %v420_v15  ;;  %2391 = vmatpush3.bf16.msra.mxu0 %v2368_v13 }
  0x9d   : > { %2272 = vmatmul.mubr.f32.gmra.mrb[2].mxu0 %v430_v16 }
  0x9e   : > { %2278 = vmatprep.mubr.f32.mxu0 %v2915_v9 }
  0xa1   : > { %2279 = vmatmul.mubr.f32.vlgmr.msra.gmra.mrb[0].mxu0 %v410_v14 }
  0xa2   : > { %2281 = vmatprep.mubr.f32.mxu0 %v420_v15 }
  0xa5   : > { %2282 = vmatmul.mubr.f32.gmra.mrb[2].mxu0 %v430_v16 }
 0x174   : > { %v2280_v56 = vpop.f32.mrb[0].mxu0 }
 0x175   : > { %v931_v57 = vand.u32 4294901760, %v2280_v56  ;;  %v899_v58 = vpop.f32.mrb[1].mxu0 }
 0x176   : > { %v928_v59 = vand.u32 4294901760, %v899_v58 }
 0x177   : > { %v1023_v61 = vsub.f32 %v2280_v56, %v931_v57 }
 0x178   : > { %v2392_v62 = vpack.c.bf16 %v931_v57, %v928_v59  ;;  %v1016_v63 = vsub.f32 %v899_v58, %v928_v59  ;;  %v2283_v0 = vpop.f32.mrb[2].mxu0 }
 0x179   : > { %v1024_v1 = vand.u32 4294901760, %v1023_v61  ;;  %v1433_v2 = vand.u32 4294901760, %v2283_v0  ;;  %v911_v3 = vpop.f32.mrb[3].mxu0 }
 0x17a   : > { %v1017_v4 = vand.u32 4294901760, %v1016_v63  ;;  %v1430_v5 = vand.u32 4294901760, %v911_v3  ;;  %2393 = vmatprep.subr.bf16.mxu1 %v2392_v62  ;;  %v2400_v7 = vpack.c.bf16 %v1023_v61, %v1016_v63 }
 0x17b   : > { %v1025_v8 = vsub.f32 %v1023_v61, %v1024_v1  ;;  %v1525_v9 = vsub.f32 %v2283_v0, %v1433_v2  ;;  %2395 = vmatpush3.bf16.msra.mxu1 %v2392_v62 }
 0x17c   : > { %v1018_v10 = vsub.f32 %v1016_v63, %v1017_v4  ;;  %v2416_v11 = vpack.c.bf16 %v1433_v2, %v1430_v5  ;;  %v1518_v12 = vsub.f32 %v911_v3, %v1430_v5  ;;  %v2408_v13 = vpack.c.bf16 %v1024_v1, %v1017_v4 }
 0x17d   : > { %v1526_v14 = vand.u32 4294901760, %v1525_v9  ;;  %v1026_v15 = vand.u32 4294901760, %v1025_v8 }
 0x17e   : > { %v1519_v16 = vand.u32 4294901760, %v1518_v12  ;;  %2289 = vmatmul.mubr.f32.vlgmr.msra.gmra.mrb[0].mxu1 %v1008_v6  ;;  %v1019_v17 = vand.u32 4294901760, %v1018_v10  ;;  %v2424_v18 = vpack.c.bf16 %v1525_v9, %v1518_v12 }
 0x17f   : > { %v1527_v19 = vsub.f32 %v1525_v9, %v1526_v14  ;;  %2295 = vmatprep.mubr.f32.mxu1 %v2926_v46 }
 0x180   : > { %v1520_v20 = vsub.f32 %v1518_v12, %v1519_v16  ;;  %v2396_v21 = vpack.c.bf16 %v1026_v15, %v1019_v17  ;;  %v2432_v22 = vpack.c.bf16 %v1526_v14, %v1519_v16 }
 0x181   : > { %v1528_v23 = vand.u32 4294901760, %v1527_v19 }
 0x182   : > { %v1521_v24 = vand.u32 4294901760, %v1520_v20  ;;  %2397 = vmatprep.subr.bf16.mxu1 %v2396_v21 }
 0x183   : > { %2399 = vmatpush3.bf16.msra.mxu1 %v2396_v21 }
 0x184   : > { %2401 = vmatprep.subr.bf16.mxu1 %v2400_v7  ;;  %v2420_v25 = vpack.c.bf16 %v1528_v23, %v1521_v24 }
 0x186   : > { %2296 = vmatmul.mubr.f32.vlgmr.msra.gmra.mrb[0].mxu1 %v2941_v53 }
 0x187   : > { %2403 = vmatpush3.bf16.msra.mxu1 %v2400_v7  ;;  %2302 = vmatprep.mubr.f32.mxu1 %v2929_v47 }
 0x188   : > { %2405 = vmatprep.subr.bf16.mxu1 %v2392_v62 }
 0x18e   : > { %2303 = vmatmul.mubr.f32.vlgmr.msra.gmra.mrb[0].mxu1 %v2944_v54 }
 0x18f   : > { %2407 = vmatpush3.bf16.msra.mxu1 %v2392_v62  ;;  %2309 = vmatprep.mubr.f32.mxu1 %v2932_v48 }
 0x190   : > { %2409 = vmatprep.subr.bf16.mxu1 %v2408_v13 }
 0x196   : > { %2310 = vmatmul.mubr.f32.vlgmr.msra.gmra.mrb[0].mxu1 %v2947_v55 }
 0x197   : > { %2411 = vmatpush3.bf16.msra.mxu1 %v2408_v13  ;;  %2316 = vmatprep.mubr.f32.mxu1 %v2926_v46 }
 0x198   : > { %2413 = vmatprep.subr.bf16.mxu1 %v2392_v62 }
 0x19e   : > { %2317 = vmatmul.mubr.f32.vlgmr.msra.gmra.mrb[0].mxu1 %v2941_v53 }
 0x19f   : > { %2415 = vmatpush3.bf16.msra.mxu1 %v2392_v62  ;;  %2323 = vmatprep.mubr.f32.mxu1 %v2926_v46 }
 0x1a0   : > { %2417 = vmatprep.subr.bf16.mxu1 %v2416_v11 }
 0x1a6   : > { %2324 = vmatmul.mubr.f32.vlgmr.msra.gmra.mrb[0].mxu1 %v2941_v53 }
 0x1a7   : > { %2419 = vmatpush3.bf16.msra.mxu1 %v2416_v11  ;;  %2330 = vmatprep.mubr.f32.mxu1 %v2936_v50 }
 0x1a8   : > { %2421 = vmatprep.subr.bf16.mxu1 %v2420_v25 }
 0x1aa   : > { %2331 = vmatmul.mubr.f32.vlgmr.msra.gmra.mrb[2].mxu1 %v1008_v6 }
 0x1ab   : > { %2423 = vmatpush3.bf16.msra.mxu1 %v2420_v25  ;;  %2337 = vmatprep.mubr.f32.mxu1 %v2926_v46 }
 0x1ac   : > { %2425 = vmatprep.subr.bf16.mxu1 %v2424_v18 }
 0x1b2   : > { %2338 = vmatmul.mubr.f32.vlgmr.msra.gmra.mrb[2].mxu1 %v2941_v53 }
 0x1b3   : > { %2427 = vmatpush3.bf16.msra.mxu1 %v2424_v18  ;;  %2344 = vmatprep.mubr.f32.mxu1 %v2929_v47 }
 0x1b4   : > { %2429 = vmatprep.subr.bf16.mxu1 %v2416_v11 }
 0x1ba   : > { %2345 = vmatmul.mubr.f32.vlgmr.msra.gmra.mrb[2].mxu1 %v2944_v54 }
 0x1bb   : > { %2431 = vmatpush3.bf16.msra.mxu1 %v2416_v11  ;;  %2351 = vmatprep.mubr.f32.mxu1 %v2932_v48 }
 0x1bc   : > { %2433 = vmatprep.subr.bf16.mxu1 %v2432_v22 }
 0x1c2   : > { %2352 = vmatmul.mubr.f32.vlgmr.msra.gmra.mrb[2].mxu1 %v2947_v55 }
 0x1c3   : > { %2435 = vmatpush3.bf16.msra.mxu1 %v2432_v22  ;;  %2358 = vmatprep.mubr.f32.mxu1 %v2926_v46 }
 0x1c4   : > { %2437 = vmatprep.subr.bf16.mxu1 %v2416_v11 }
 0x1ca   : > { %2359 = vmatmul.mubr.f32.vlgmr.msra.gmra.mrb[2].mxu1 %v2941_v53 }
 0x1cb   : > { %2439 = vmatpush3.bf16.msra.mxu1 %v2416_v11  ;;  %2365 = vmatprep.mubr.f32.mxu1 %v2926_v46 }
 0x1d2   : > { %2366 = vmatmul.mubr.f32.vlgmr.msra.gmra.mrb[2].mxu1 %v2941_v53 }
 0x279   : > { %v2325_v26 = vpop.f32.mrb[0].mxu1 }
 0x27a   : > { %1932 = vst.msk [vmem:[%s309_s18 + $0x8] sm:$0xff] %vm320_vm0, %v2325_v26  ;;  %v1419_v27 = vpop.f32.mrb[1].mxu1 }
 0x27b   : > { %1931 = vst.msk [vmem:[%s309_s18] sm:$0xff] %vm320_vm0, %v1419_v27 }
 0x2a5   : > { %v2367_v28 = vpop.f32.mrb[2].mxu1 }
 0x2a6   : > { %1934 = vst.msk [vmem:[%s309_s18 + $0x18] sm:$0xff] %vm320_vm0, %v2367_v28  ;;  %v1921_v29 = vpop.f32.mrb[3].mxu1 }
 0x2a7   : > { %1933 = vst.msk [vmem:[%s309_s18 + $0x10] sm:$0xff] %vm320_vm0, %v1921_v29 }
 0x2a8   : > { %s2139_s7 = sshll.u32 %s2675_s15, 8  ;;  %s1968_s19 = sshll.u32 %s309_s18, 4  ;;  %s1969_s19 = int_to_ptr.vmem [resolvable:$true] %s1968_s19 }
 0x2a9   : > { %s1951_s29 = scalar_lea.hbm %s3022_s3, %s2139_s7  ;;  %s2695_s11 = smov 256  }
 0x2aa   : > { %p3032_p4 = scmp.ne.s32.totalorder %s3029_s25, 0  ;;  %s2696_s6 = smov 1024  }
 0x2ab   : > { %s2697_s8 = smov 2   ;;  %s2698_s20 = smov 128  }
 0x2ac   : > { %2493 = sst [smem:[#allocation12]] (%p3032_p4), %s2695_s11  ;;  %s2699_s15 = smov 8  }
 0x2ad   : > { %2494 = sst [smem:[#allocation12 + $0x1]] (%p3032_p4), %s2696_s6  ;;  %s2700_s9 = smov [#allocation11]  }
 0x2ae   : > { %2495 = sst [smem:[#allocation12 + $0x2]] (%p3032_p4), %s2697_s8  ;;  %s2701_s4 = smov 0  }
 0x2af   : > { %2496 = sst [smem:[#allocation12 + $0x3]] (%p3032_p4), %s2698_s20 }
 0x2b0   : > { %2497 = sst [smem:[#allocation12 + $0x4]] (%p3032_p4), %s2698_s20 }
 0x2b1   : > { %2498 = sst [smem:[#allocation12 + $0x5]] (%p3032_p4), %s2699_s15 }
 0x2b2   : > { %2499 = dma.general (%p3032_p4), %s1969_s19, 512, %s1951_s29, %s1936_s24, %s2700_s9, [#allocation12], %s2701_s4, 0  }
 0x2b3 PF: > { %p2505_p8 = scmp.ge.s32.totalorder %s2683_s17, 2  ;;  %s1996_s30 = sand.u32 1, %s2663_s12  }
 0x2b4   : > { %p3033_p12 = scmp.ne.s32.totalorder %s3030_s27, 0  ;;  %s1997_s0 = scalar_lea.sflag [#allocation4], %s1996_s30 }
 0x2b6   : > { %p2502_p13 = pnand %p2505_p8, %p3033_p12 }
 0x2b8   : > { %2658 = dma.done.wait (!%p2502_p13), %s1997_s0, 512  }
 0x2b9   : > { %2660 = vsyncadd (!%p2502_p13), %s1997_s0, 4294966784  ;;  %s22_s17 = sadd.s32 1, %s2683_s17   ;;  %s3034_s25 = sld [smem:[#allocation17_spill]] }
 0x2ba   : > { %p19_p0 = scmp.ge.s32.totalorder %s22_s17, 6   ;;  %s3035_s12 = smov %s2667_s13 }
 0x2bb   : > { %s3036_s13 = smov %s2671_s14  ;;  %s3037_s14 = smov %s2782_s26 }
 0x2bc   : > { %s3038_s15 = smov %s2679_s16  ;;  %21 = sbr.rel (!%p19_p0) target bundleno = 10 (0xa), region = 111 }
 0x2bf   : > { %s3039_s16 = smov %s3034_s25 }
 0x2c3   :  { %2002 = vsyncpa [#allocation3], 1 }
 0x2c4   :  { %2004 = vsyncpa [#allocation3 + $0x1], 1 }
 0x2c5   :  { %2005 = vsyncpa [#allocation6], 1 }
 0x2c6   :  { %2007 = vsyncpa [#allocation6 + $0x1], 1 }
 0x2c7   :  { %2008 = vsyncpa [#allocation4], 1 }
 0x2c8   :  { %2010 = vsyncpa [#allocation4 + $0x1], 1 }

</bundles_post_ra>
